<compile_context>
chip_gen: v7x
topology: tpu7x:2x2x1
jax: 0.10.0
libtpu: 0.0.40
codegen_flags: <defaults>
</compile_context>

<pallas_src>
import functools
import math

import jax
import jax.numpy as jnp
from jax import lax
from jax.experimental import pallas as pl
from jax.experimental.pallas import tpu as pltpu


_MASK_VALUE = -1e30  # large-but-finite keeps masked-score math NaN-free


def _flash_attn_kernel(q_ref, k_ref, v_ref, o_ref, m_sc, l_sc, acc_sc, *,
                       hblk, d, dv, tk, kv_valid, need_kv_mask):
    """One (head-group, q-tile, kv-tile) flash-attention step.

    Heads-in-lanes layout:
      q_ref: (tq, hblk*d)   k_ref: (tk, hblk*d)   v_ref: (tk, hblk*dv)
      o_ref: (tq, hblk*dv)
      m_sc/l_sc: (hblk, tq, 128) f32 lane-replicated running max / denominator
      acc_sc:    (tq, hblk*dv) f32 output accumulator
    """
    kv = pl.program_id(2)
    last_kv = pl.num_programs(2) - 1

    @pl.when(kv == 0)
    def _init():
        m_sc[...] = jnp.full(m_sc.shape, -jnp.inf, jnp.float32)
        l_sc[...] = jnp.zeros(l_sc.shape, jnp.float32)
        acc_sc[...] = jnp.zeros(acc_sc.shape, jnp.float32)

    q = q_ref[...]   # bf16; softmax scale already folded in by the wrapper
    k = k_ref[...]
    v = v_ref[...]
    tq = q.shape[0]

    # Padding mask as an additive bias computed ONCE per kv step (not per head,
    # not iota+cmp+where over every score): it is identically zero except on the
    # final, partially padded kv tile, so non-final steps pay one vadd per head.
    if need_kv_mask:
        key_idx = kv * tk + lax.broadcasted_iota(jnp.int32, (1, tk), 1)
        bias = jnp.where(key_idx < kv_valid, 0.0, _MASK_VALUE).astype(jnp.float32)

    pv_parts = []
    alpha_parts = []
    for h in range(hblk):                         # static, unrolled head loop
        q_h = q[:, h * d:(h + 1) * d]             # (tq, d)  static lane slice
        k_h = k[:, h * d:(h + 1) * d]             # (tk, d)
        v_h = v[:, h * dv:(h + 1) * dv]           # (tk, dv)

        # Scores on the fast bf16 MXU path with f32 accumulation; contraction
        # over the last dims (no explicit k.T / XLU transpose).
        s = lax.dot_general(q_h, k_h, (((1,), (1,)), ((), ())),
                            preferred_element_type=jnp.float32)   # (tq, tk) f32
        if need_kv_mask:
            s = s + bias

        # Online softmax with lane-replicated (tq, 128) m/l state: full-vreg
        # loads/stores instead of masked (..., 1) partial stores every step.
        m_prev = m_sc[h]                                   # (tq, 128)
        l_prev = l_sc[h]                                   # (tq, 128)
        m_cur = jnp.max(s, axis=-1, keepdims=True)         # (tq, 1)
        m_next = jnp.maximum(m_prev, m_cur)                # (tq, 128) replicated
        alpha = jnp.exp(m_prev - m_next)                   # (tq, 128) replicated
        # TODO(synk): optional bf16 exp on v6e/v7x (not v5e) left unapplied to
        # keep accuracy margin; exps stay f32.
        p = jnp.exp(s - m_next[:, :1])                     # (tq, tk) f32
        l_sc[h] = alpha * l_prev + jnp.sum(p, axis=-1, keepdims=True)
        m_sc[h] = m_next

        # Second matmul also on the bf16 MXU path, f32 accumulation.
        pv = lax.dot_general(p.astype(v_h.dtype), v_h, (((1,), (0,)), ((), ())),
                             preferred_element_type=jnp.float32)  # (tq, dv)
        pv_parts.append(pv)
        if dv <= 128:
            alpha_parts.append(alpha[:, :dv])              # replicated -> exact
        else:
            alpha_parts.append(jnp.broadcast_to(alpha[:, :1], (tq, dv)))

    pv_cat = pv_parts[0] if hblk == 1 else jnp.concatenate(pv_parts, axis=-1)
    al_cat = alpha_parts[0] if hblk == 1 else jnp.concatenate(alpha_parts, axis=-1)
    # One lane-dense read-modify-write of the accumulator per kv step.
    acc_sc[...] = al_cat * acc_sc[...] + pv_cat

    # TODO(synk): torch.nn.Dropout(p=0.5) is identity in eval mode; training-mode
    # stochastic dropout (pltpu.prng_*) is intentionally not applied here.

    @pl.when(kv == last_kv)
    def _finalize():
        acc = acc_sc[...]
        outs = []
        for h in range(hblk):
            inv_l = pl.reciprocal(l_sc[h], approx=True)    # EUP vrcp, ~free
            if dv <= 128:
                inv = inv_l[:, :dv]
            else:
                inv = jnp.broadcast_to(inv_l[:, :1], (acc.shape[0], dv))
            outs.append(acc[:, h * dv:(h + 1) * dv] * inv)
        o = outs[0] if hblk == 1 else jnp.concatenate(outs, axis=-1)
        o_ref[...] = o.astype(o_ref.dtype)                 # single lane-dense store


def _default_tiles():
    # v5e: 4x128^2 MXUs and a single vst slot -> modest tiles.
    # v6e/v7x: grow the kv tile first (fewer per-step rescales and fixed grid
    # overhead); keep tq=128 so the per-head (tq, tk) f32 score tile is bounded.
    try:
        kind = jax.devices()[0].device_kind.lower()
    except Exception:
        kind = ""
    if "v5 lite" in kind or "v5e" in kind or "v5litepod" in kind:
        return 128, 128
    return 128, 512


def _choose_hblk(bh, d, dv, max_hblk):
    """Smallest head-packing factor making the folded lane width >= 128, while
    keeping bh // hblk >= 2 so both v7x TensorCores get parallel grid work."""
    min_feat = max(1, min(d, dv))
    target = max(1, pl.cdiv(128, min_feat))
    best = 1
    for h in range(1, min(bh, max_hblk) + 1):
        if bh % h != 0:
            continue
        if bh >= 2 and bh // h < 2:
            continue
        best = h
        if h >= target:
            break
    return best


def _pad_axis_to(x, axis, target):
    cur = x.shape[axis]
    if cur == target:
        return x
    pad = [(0, 0)] * x.ndim
    pad[axis] = (0, target - cur)
    return jnp.pad(x, pad)


def attention(q, k, v, scale_factor=None, *, tq=None, tk=None,
              head_block_max=4, compute_dtype=jnp.bfloat16):
    """q: (B,H,Sq,D), k: (B,H,Sk,D), v: (B,H,Sk,Dv) -> (B,H,Sq,Dv)."""
    B, H, Sq, D = q.shape
    Sk = k.shape[2]
    Dv = v.shape[-1]
    if scale_factor is None:
        scale_factor = 1.0 / math.sqrt(D)
    out_dtype = q.dtype

    dtq, dtk = _default_tiles()
    tq = dtq if tq is None else tq
    tk = dtk if tk is None else tk

    BH = B * H
    hblk = _choose_hblk(BH, D, Dv, max(1, head_block_max))
    if hblk >= 4:
        tk = min(tk, 256)   # keep the per-step score / VPU working set bounded
    G = BH // hblk

    if Sq <= tq:
        tq = Sq
    Sq_pad = pl.cdiv(Sq, tq) * tq
    if Sk <= tk:
        tk = Sk
    Sk_pad = pl.cdiv(Sk, tk) * tk
    need_kv_mask = Sk_pad != Sk

    # Heads-in-lanes layout (G, S, hblk*feat): lane-dense blocks/output even when
    # D/Dv < 128. The softmax scale is folded into the bf16 cast of q (one fused
    # elementwise XLA op; no per-kv-step rescale inside the kernel).
    def to_lanes(x, s_len, feat):
        return x.reshape(G, hblk, s_len, feat).transpose(0, 2, 1, 3).reshape(
            G, s_len, hblk * feat)

    qf = to_lanes((q * jnp.asarray(scale_factor, q.dtype)).astype(compute_dtype),
                  Sq, D)
    kf = to_lanes(k.astype(compute_dtype), Sk, D)
    vf = to_lanes(v.astype(compute_dtype), Sk, Dv)

    qf = _pad_axis_to(qf, 1, Sq_pad)
    kf = _pad_axis_to(kf, 1, Sk_pad)
    vf = _pad_axis_to(vf, 1, Sk_pad)

    grid = (G, Sq_pad // tq, Sk_pad // tk)

    kernel = functools.partial(
        _flash_attn_kernel, hblk=hblk, d=D, dv=Dv, tk=tk,
        kv_valid=Sk, need_kv_mask=need_kv_mask)

    out = pl.pallas_call(
        kernel,
        out_shape=jax.ShapeDtypeStruct((G, Sq_pad, hblk * Dv), out_dtype),
        grid=grid,
        in_specs=[
            pl.BlockSpec((None, tq, hblk * D), lambda g, qi, ki: (g, qi, 0)),
            pl.BlockSpec((None, tk, hblk * D), lambda g, qi, ki: (g, ki, 0)),
            pl.BlockSpec((None, tk, hblk * Dv), lambda g, qi, ki: (g, ki, 0)),
        ],
        out_specs=pl.BlockSpec((None, tq, hblk * Dv), lambda g, qi, ki: (g, qi, 0)),
        scratch_shapes=[
            pltpu.VMEM((hblk, tq, 128), jnp.float32),   # running max (replicated)
            pltpu.VMEM((hblk, tq, 128), jnp.float32),   # running denom (replicated)
            pltpu.VMEM((tq, hblk * Dv), jnp.float32),   # output accumulator
        ],
        compiler_params=pltpu.CompilerParams(
            dimension_semantics=("parallel", "parallel", "arbitrary"),
            # ~2 MiB actually used at the default tiles; 32 MiB leaves headroom
            # for bigger tk and stays under v7x's 64 MiB/TC physical VMEM.
            vmem_limit_bytes=32 * 1024 * 1024,
        ),
    )(qf, kf, vf)

    out = out[:, :Sq, :]                                   # drop padded q rows
    out = out.reshape(G, Sq, hblk, Dv).transpose(0, 2, 1, 3).reshape(B, H, Sq, Dv)
    return out


def _reference(q, k, v, scale_factor):
    s = jnp.einsum("bhqd,bhkd->bhqk", q, k) * scale_factor
    p = jax.nn.softmax(s, axis=-1)
    return jnp.einsum("bhqk,bhkd->bhqd", p, v)


if __name__ == "__main__":
    # Small, self-consistent attention shapes (the fuzzer's global tensors are
    # shape-inconsistent): B=2, H=4, Sq=8, Sk=16, D=Dv=32.
    key = jax.random.PRNGKey(0)
    kq, kk, kv_ = jax.random.split(key, 3)
    B, H, Sq, Sk, D = 2, 4, 8, 16, 32

    q = jax.random.normal(kq, (B, H, Sq, D), dtype=jnp.float32)
    k = jax.random.normal(kk, (B, H, Sk, D), dtype=jnp.float32)
    v = jax.random.normal(kv_, (B, H, Sk, D), dtype=jnp.float32)
    scale_factor = 1.0 / math.sqrt(D)

    out = attention(q, k, v, scale_factor)
    jax.block_until_ready(out)
    ref = _reference(q, k, v, scale_factor)
    assert out.shape == (B, H, Sq, D)
    # bf16 MXU inputs + approx reciprocal -> compare against an f32 reference
    # with a correspondingly relaxed tolerance.
    assert jnp.allclose(out, ref, atol=2e-2, rtol=2e-2), \
        float(jnp.max(jnp.abs(out - ref)))

    # Exercise the tiled online-softmax path (multi q/kv tiles + kv padding
    # bias) at tiny shapes by forcing small tiles: Sq=16, Sk=20 -> padded to 24.
    key2 = jax.random.PRNGKey(1)
    kq2, kk2, kv2 = jax.random.split(key2, 3)
    B2, H2, Sq2, Sk2, D2 = 1, 2, 16, 20, 32
    q2 = jax.random.normal(kq2, (B2, H2, Sq2, D2), dtype=jnp.float32)
    k2 = jax.random.normal(kk2, (B2, H2, Sk2, D2), dtype=jnp.float32)
    v2 = jax.random.normal(kv2, (B2, H2, Sk2, D2), dtype=jnp.float32)
    out2 = attention(q2, k2, v2, 1.0 / math.sqrt(D2), tq=8, tk=8)
    jax.block_until_ready(out2)
    ref2 = _reference(q2, k2, v2, 1.0 / math.sqrt(D2))
    assert jnp.allclose(out2, ref2, atol=2e-2, rtol=2e-2), \
        float(jnp.max(jnp.abs(out2 - ref2)))

    print("KERNEL_OK")
</pallas_src>

<mosaic_0001>
module attributes {stable_mosaic.version = 11 : i64} {
  func.func @_flash_attn_kernel(%arg0: i32, %arg1: i32, %arg2: i32, %arg3: memref<1x8x128xbf16, #tpu.memory_space<vmem>>, %arg4: memref<1x16x128xbf16, #tpu.memory_space<vmem>>, %arg5: memref<1x16x128xbf16, #tpu.memory_space<vmem>>, %arg6: memref<1x8x128xf32, #tpu.memory_space<vmem>>, %arg7: memref<4x8x128xf32, #tpu.memory_space<vmem>>, %arg8: memref<4x8x128xf32, #tpu.memory_space<vmem>>, %arg9: memref<8x128xf32, #tpu.memory_space<vmem>>) attributes {dimension_semantics = [#tpu.dimension_semantics<parallel>, #tpu.dimension_semantics<parallel>, #tpu.dimension_semantics<arbitrary>], iteration_bounds = array<i64: 2, 1, 1>, scalar_prefetch = 0 : i64, scratch_operands = 3 : i64, tpu.core_type = #tpu.core_type<tc>, window_params = [{transform_indices = @transform_0, window_bounds = array<i64: 1, 8, 128>}, {transform_indices = @transform_1, window_bounds = array<i64: 1, 16, 128>}, {transform_indices = @transform_2, window_bounds = array<i64: 1, 16, 128>}, {transform_indices = @transform_3, window_bounds = array<i64: 1, 8, 128>}]} {
    %c0_i32 = arith.constant 0 : i32
    %0 = arith.cmpi eq, %arg2, %c0_i32 : i32
    %1 = arith.extui %0 : i1 to i32
    %c0_i32_0 = arith.constant 0 : i32
    %2 = arith.cmpi ne, %1, %c0_i32_0 : i32
    scf.if %2 {
      %cst_75 = arith.constant 0xFF800000 : f32
      %146 = vector.broadcast %cst_75 : f32 to vector<4x8x128xf32>
      %c0_76 = arith.constant 0 : index
      %c0_77 = arith.constant 0 : index
      %c0_78 = arith.constant 0 : index
      %147 = vector.load %arg7[%c0_76, %c0_77, %c0_78] : memref<4x8x128xf32, #tpu.memory_space<vmem>>, vector<4x8x128xf32>
      tpu.vector_store %arg7[%c0_76, %c0_77, %c0_78], %146 {strides = array<i32>} : memref<4x8x128xf32, #tpu.memory_space<vmem>>, vector<4x8x128xf32>,
      %cst_79 = arith.constant 0.000000e+00 : f32
      %148 = vector.broadcast %cst_79 : f32 to vector<4x8x128xf32>
      %c0_80 = arith.constant 0 : index
      %c0_81 = arith.constant 0 : index
      %c0_82 = arith.constant 0 : index
      %149 = vector.load %arg8[%c0_80, %c0_81, %c0_82] : memref<4x8x128xf32, #tpu.memory_space<vmem>>, vector<4x8x128xf32>
      tpu.vector_store %arg8[%c0_80, %c0_81, %c0_82], %148 {strides = array<i32>} : memref<4x8x128xf32, #tpu.memory_space<vmem>>, vector<4x8x128xf32>,
      %cst_83 = arith.constant 0.000000e+00 : f32
      %150 = vector.broadcast %cst_83 : f32 to vector<8x128xf32>
      %c0_84 = arith.constant 0 : index
      %c0_85 = arith.constant 0 : index
      %151 = vector.load %arg9[%c0_84, %c0_85] : memref<8x128xf32, #tpu.memory_space<vmem>>, vector<8x128xf32>
      tpu.vector_store %arg9[%c0_84, %c0_85], %150 {strides = array<i32>} : memref<8x128xf32, #tpu.memory_space<vmem>>, vector<8x128xf32>,
    } else {
    }
    %c0 = arith.constant 0 : index
    %c0_1 = arith.constant 0 : index
    %c0_2 = arith.constant 0 : index
    %3 = vector.load %arg3[%c0, %c0_1, %c0_2] : memref<1x8x128xbf16, #tpu.memory_space<vmem>>, vector<1x8x128xbf16>
    %4 = vector.shape_cast %3 : vector<1x8x128xbf16> to vector<8x128xbf16>
    %c0_3 = arith.constant 0 : index
    %c0_4 = arith.constant 0 : index
    %c0_5 = arith.constant 0 : index
    %5 = vector.load %arg4[%c0_3, %c0_4, %c0_5] : memref<1x16x128xbf16, #tpu.memory_space<vmem>>, vector<1x16x128xbf16>
    %6 = vector.shape_cast %5 : vector<1x16x128xbf16> to vector<16x128xbf16>
    %c0_6 = arith.constant 0 : index
    %c0_7 = arith.constant 0 : index
    %c0_8 = arith.constant 0 : index
    %7 = vector.load %arg5[%c0_6, %c0_7, %c0_8] : memref<1x16x128xbf16, #tpu.memory_space<vmem>>, vector<1x16x128xbf16>
    %8 = vector.shape_cast %7 : vector<1x16x128xbf16> to vector<16x128xbf16>
    %9 = vector.extract_strided_slice %4 {offsets = [0, 0], sizes = [8, 32], strides = [1, 1]} : vector<8x128xbf16> to vector<8x32xbf16>
    %10 = vector.extract_strided_slice %6 {offsets = [0, 0], sizes = [16, 32], strides = [1, 1]} : vector<16x128xbf16> to vector<16x32xbf16>
    %11 = vector.extract_strided_slice %8 {offsets = [0, 0], sizes = [16, 32], strides = [1, 1]} : vector<16x128xbf16> to vector<16x32xbf16>
    %cst = arith.constant dense<0.000000e+00> : vector<8x16xf32>
    %12 = tpu.matmul %9, %10, %cst {dimension_numbers = #tpu.dot_dimension_numbers<[1], [1], [0], [0], [0, 0, 1, 0], [], []>} : vector<8x32xbf16>, vector<16x32xbf16>, vector<8x16xf32> -> vector<8x16xf32>
    %c0_9 = arith.constant 0 : index
    %c0_10 = arith.constant 0 : index
    %c0_11 = arith.constant 0 : index
    %13 = vector.load %arg7[%c0_9, %c0_10, %c0_11] : memref<4x8x128xf32, #tpu.memory_space<vmem>>, vector<1x8x128xf32>
    %14 = vector.shape_cast %13 : vector<1x8x128xf32> to vector<8x128xf32>
    %c0_12 = arith.constant 0 : index
    %c0_13 = arith.constant 0 : index
    %c0_14 = arith.constant 0 : index
    %15 = vector.load %arg8[%c0_12, %c0_13, %c0_14] : memref<4x8x128xf32, #tpu.memory_space<vmem>>, vector<1x8x128xf32>
    %16 = vector.shape_cast %15 : vector<1x8x128xf32> to vector<8x128xf32>
    %cst_15 = arith.constant dense<0xFF800000> : vector<8xf32>
    %17 = vector.multi_reduction <maximumf>, %12, %cst_15 [1] : vector<8x16xf32> to vector<8xf32>
    %18 = vector.shape_cast %17 : vector<8xf32> to vector<8x1xf32>
    %19 = vector.broadcast %18 : vector<8x1xf32> to vector<8x128xf32>
    %20 = arith.maximumf %14, %19 : vector<8x128xf32>
    %21 = arith.subf %14, %20 : vector<8x128xf32>
    %22 = math.exp %21 : vector<8x128xf32>
    %23 = vector.extract_strided_slice %20 {offsets = [0, 0], sizes = [8, 1], strides = [1, 1]} : vector<8x128xf32> to vector<8x1xf32>
    %24 = vector.broadcast %23 : vector<8x1xf32> to vector<8x16xf32>
    %25 = arith.subf %12, %24 : vector<8x16xf32>
    %26 = math.exp %25 : vector<8x16xf32>
    %27 = arith.mulf %22, %16 : vector<8x128xf32>
    %cst_16 = arith.constant dense<0.000000e+00> : vector<8xf32>
    %28 = vector.multi_reduction <add>, %26, %cst_16 [1] : vector<8x16xf32> to vector<8xf32>
    %29 = vector.shape_cast %28 : vector<8xf32> to vector<8x1xf32>
    %30 = vector.broadcast %29 : vector<8x1xf32> to vector<8x128xf32>
    %31 = arith.addf %27, %30 : vector<8x128xf32>
    %c0_17 = arith.constant 0 : index
    %c0_18 = arith.constant 0 : index
    %c0_19 = arith.constant 0 : index
    %32 = vector.load %arg8[%c0_17, %c0_18, %c0_19] : memref<4x8x128xf32, #tpu.memory_space<vmem>>, vector<1x8x128xf32>
    %33 = vector.shape_cast %32 : vector<1x8x128xf32> to vector<8x128xf32>
    %34 = vector.shape_cast %31 : vector<8x128xf32> to vector<1x8x128xf32>
    tpu.vector_store %arg8[%c0_17, %c0_18, %c0_19], %34 {strides = array<i32>} : memref<4x8x128xf32, #tpu.memory_space<vmem>>, vector<1x8x128xf32>,
    %c0_20 = arith.constant 0 : index
    %c0_21 = arith.constant 0 : index
    %c0_22 = arith.constant 0 : index
    %35 = vector.load %arg7[%c0_20, %c0_21, %c0_22] : memref<4x8x128xf32, #tpu.memory_space<vmem>>, vector<1x8x128xf32>
    %36 = vector.shape_cast %35 : vector<1x8x128xf32> to vector<8x128xf32>
    %37 = vector.shape_cast %20 : vector<8x128xf32> to vector<1x8x128xf32>
    tpu.vector_store %arg7[%c0_20, %c0_21, %c0_22], %37 {strides = array<i32>} : memref<4x8x128xf32, #tpu.memory_space<vmem>>, vector<1x8x128xf32>,
    %38 = arith.truncf %26 : vector<8x16xf32> to vector<8x16xbf16>
    %cst_23 = arith.constant dense<0.000000e+00> : vector<8x32xf32>
    %39 = tpu.matmul %38, %11, %cst_23 {dimension_numbers = #tpu.dot_dimension_numbers<[1], [0], [0], [1], [0, 0, 1, 1], [], []>} : vector<8x16xbf16>, vector<16x32xbf16>, vector<8x32xf32> -> vector<8x32xf32>
    %40 = vector.extract_strided_slice %22 {offsets = [0, 0], sizes = [8, 32], strides = [1, 1]} : vector<8x128xf32> to vector<8x32xf32>
    %41 = vector.extract_strided_slice %4 {offsets = [0, 32], sizes = [8, 32], strides = [1, 1]} : vector<8x128xbf16> to vector<8x32xbf16>
    %42 = vector.extract_strided_slice %6 {offsets = [0, 32], sizes = [16, 32], strides = [1, 1]} : vector<16x128xbf16> to vector<16x32xbf16>
    %43 = vector.extract_strided_slice %8 {offsets = [0, 32], sizes = [16, 32], strides = [1, 1]} : vector<16x128xbf16> to vector<16x32xbf16>
    %cst_24 = arith.constant dense<0.000000e+00> : vector<8x16xf32>
    %44 = tpu.matmul %41, %42, %cst_24 {dimension_numbers = #tpu.dot_dimension_numbers<[1], [1], [0], [0], [0, 0, 1, 0], [], []>} : vector<8x32xbf16>, vector<16x32xbf16>, vector<8x16xf32> -> vector<8x16xf32>
    %c1 = arith.constant 1 : index
    %c0_25 = arith.constant 0 : index
    %c0_26 = arith.constant 0 : index
    %45 = vector.load %arg7[%c1, %c0_25, %c0_26] : memref<4x8x128xf32, #tpu.memory_space<vmem>>, vector<1x8x128xf32>
    %46 = vector.shape_cast %45 : vector<1x8x128xf32> to vector<8x128xf32>
    %c1_27 = arith.constant 1 : index
    %c0_28 = arith.constant 0 : index
    %c0_29 = arith.constant 0 : index
    %47 = vector.load %arg8[%c1_27, %c0_28, %c0_29] : memref<4x8x128xf32, #tpu.memory_space<vmem>>, vector<1x8x128xf32>
    %48 = vector.shape_cast %47 : vector<1x8x128xf32> to vector<8x128xf32>
    %cst_30 = arith.constant dense<0xFF800000> : vector<8xf32>
    %49 = vector.multi_reduction <maximumf>, %44, %cst_30 [1] : vector<8x16xf32> to vector<8xf32>
    %50 = vector.shape_cast %49 : vector<8xf32> to vector<8x1xf32>
    %51 = vector.broadcast %50 : vector<8x1xf32> to vector<8x128xf32>
    %52 = arith.maximumf %46, %51 : vector<8x128xf32>
    %53 = arith.subf %46, %52 : vector<8x128xf32>
    %54 = math.exp %53 : vector<8x128xf32>
    %55 = vector.extract_strided_slice %52 {offsets = [0, 0], sizes = [8, 1], strides = [1, 1]} : vector<8x128xf32> to vector<8x1xf32>
    %56 = vector.broadcast %55 : vector<8x1xf32> to vector<8x16xf32>
    %57 = arith.subf %44, %56 : vector<8x16xf32>
    %58 = math.exp %57 : vector<8x16xf32>
    %59 = arith.mulf %54, %48 : vector<8x128xf32>
    %cst_31 = arith.constant dense<0.000000e+00> : vector<8xf32>
    %60 = vector.multi_reduction <add>, %58, %cst_31 [1] : vector<8x16xf32> to vector<8xf32>
    %61 = vector.shape_cast %60 : vector<8xf32> to vector<8x1xf32>
    %62 = vector.broadcast %61 : vector<8x1xf32> to vector<8x128xf32>
    %63 = arith.addf %59, %62 : vector<8x128xf32>
    %c1_32 = arith.constant 1 : index
    %c0_33 = arith.constant 0 : index
    %c0_34 = arith.constant 0 : index
    %64 = vector.load %arg8[%c1_32, %c0_33, %c0_34] : memref<4x8x128xf32, #tpu.memory_space<vmem>>, vector<1x8x128xf32>
    %65 = vector.shape_cast %64 : vector<1x8x128xf32> to vector<8x128xf32>
    %66 = vector.shape_cast %63 : vector<8x128xf32> to vector<1x8x128xf32>
    tpu.vector_store %arg8[%c1_32, %c0_33, %c0_34], %66 {strides = array<i32>} : memref<4x8x128xf32, #tpu.memory_space<vmem>>, vector<1x8x128xf32>,
    %c1_35 = arith.constant 1 : index
    %c0_36 = arith.constant 0 : index
    %c0_37 = arith.constant 0 : index
    %67 = vector.load %arg7[%c1_35, %c0_36, %c0_37] : memref<4x8x128xf32, #tpu.memory_space<vmem>>, vector<1x8x128xf32>
    %68 = vector.shape_cast %67 : vector<1x8x128xf32> to vector<8x128xf32>
    %69 = vector.shape_cast %52 : vector<8x128xf32> to vector<1x8x128xf32>
    tpu.vector_store %arg7[%c1_35, %c0_36, %c0_37], %69 {strides = array<i32>} : memref<4x8x128xf32, #tpu.memory_space<vmem>>, vector<1x8x128xf32>,
    %70 = arith.truncf %58 : vector<8x16xf32> to vector<8x16xbf16>
    %cst_38 = arith.constant dense<0.000000e+00> : vector<8x32xf32>
    %71 = tpu.matmul %70, %43, %cst_38 {dimension_numbers = #tpu.dot_dimension_numbers<[1], [0], [0], [1], [0, 0, 1, 1], [], []>} : vector<8x16xbf16>, vector<16x32xbf16>, vector<8x32xf32> -> vector<8x32xf32>
    %72 = vector.extract_strided_slice %54 {offsets = [0, 0], sizes = [8, 32], strides = [1, 1]} : vector<8x128xf32> to vector<8x32xf32>
    %73 = vector.extract_strided_slice %4 {offsets = [0, 64], sizes = [8, 32], strides = [1, 1]} : vector<8x128xbf16> to vector<8x32xbf16>
    %74 = vector.extract_strided_slice %6 {offsets = [0, 64], sizes = [16, 32], strides = [1, 1]} : vector<16x128xbf16> to vector<16x32xbf16>
    %75 = vector.extract_strided_slice %8 {offsets = [0, 64], sizes = [16, 32], strides = [1, 1]} : vector<16x128xbf16> to vector<16x32xbf16>
    %cst_39 = arith.constant dense<0.000000e+00> : vector<8x16xf32>
    %76 = tpu.matmul %73, %74, %cst_39 {dimension_numbers = #tpu.dot_dimension_numbers<[1], [1], [0], [0], [0, 0, 1, 0], [], []>} : vector<8x32xbf16>, vector<16x32xbf16>, vector<8x16xf32> -> vector<8x16xf32>
    %c2 = arith.constant 2 : index
    %c0_40 = arith.constant 0 : index
    %c0_41 = arith.constant 0 : index
    %77 = vector.load %arg7[%c2, %c0_40, %c0_41] : memref<4x8x128xf32, #tpu.memory_space<vmem>>, vector<1x8x128xf32>
    %78 = vector.shape_cast %77 : vector<1x8x128xf32> to vector<8x128xf32>
    %c2_42 = arith.constant 2 : index
    %c0_43 = arith.constant 0 : index
    %c0_44 = arith.constant 0 : index
    %79 = vector.load %arg8[%c2_42, %c0_43, %c0_44] : memref<4x8x128xf32, #tpu.memory_space<vmem>>, vector<1x8x128xf32>
    %80 = vector.shape_cast %79 : vector<1x8x128xf32> to vector<8x128xf32>
    %cst_45 = arith.constant dense<0xFF800000> : vector<8xf32>
    %81 = vector.multi_reduction <maximumf>, %76, %cst_45 [1] : vector<8x16xf32> to vector<8xf32>
    %82 = vector.shape_cast %81 : vector<8xf32> to vector<8x1xf32>
    %83 = vector.broadcast %82 : vector<8x1xf32> to vector<8x128xf32>
    %84 = arith.maximumf %78, %83 : vector<8x128xf32>
    %85 = arith.subf %78, %84 : vector<8x128xf32>
    %86 = math.exp %85 : vector<8x128xf32>
    %87 = vector.extract_strided_slice %84 {offsets = [0, 0], sizes = [8, 1], strides = [1, 1]} : vector<8x128xf32> to vector<8x1xf32>
    %88 = vector.broadcast %87 : vector<8x1xf32> to vector<8x16xf32>
    %89 = arith.subf %76, %88 : vector<8x16xf32>
    %90 = math.exp %89 : vector<8x16xf32>
    %91 = arith.mulf %86, %80 : vector<8x128xf32>
    %cst_46 = arith.constant dense<0.000000e+00> : vector<8xf32>
    %92 = vector.multi_reduction <add>, %90, %cst_46 [1] : vector<8x16xf32> to vector<8xf32>
    %93 = vector.shape_cast %92 : vector<8xf32> to vector<8x1xf32>
    %94 = vector.broadcast %93 : vector<8x1xf32> to vector<8x128xf32>
    %95 = arith.addf %91, %94 : vector<8x128xf32>
    %c2_47 = arith.constant 2 : index
    %c0_48 = arith.constant 0 : index
    %c0_49 = arith.constant 0 : index
    %96 = vector.load %arg8[%c2_47, %c0_48, %c0_49] : memref<4x8x128xf32, #tpu.memory_space<vmem>>, vector<1x8x128xf32>
    %97 = vector.shape_cast %96 : vector<1x8x128xf32> to vector<8x128xf32>
    %98 = vector.shape_cast %95 : vector<8x128xf32> to vector<1x8x128xf32>
    tpu.vector_store %arg8[%c2_47, %c0_48, %c0_49], %98 {strides = array<i32>} : memref<4x8x128xf32, #tpu.memory_space<vmem>>, vector<1x8x128xf32>,
    %c2_50 = arith.constant 2 : index
    %c0_51 = arith.constant 0 : index
    %c0_52 = arith.constant 0 : index
    %99 = vector.load %arg7[%c2_50, %c0_51, %c0_52] : memref<4x8x128xf32, #tpu.memory_space<vmem>>, vector<1x8x128xf32>
    %100 = vector.shape_cast %99 : vector<1x8x128xf32> to vector<8x128xf32>
    %101 = vector.shape_cast %84 : vector<8x128xf32> to vector<1x8x128xf32>
    tpu.vector_store %arg7[%c2_50, %c0_51, %c0_52], %101 {strides = array<i32>} : memref<4x8x128xf32, #tpu.memory_space<vmem>>, vector<1x8x128xf32>,
    %102 = arith.truncf %90 : vector<8x16xf32> to vector<8x16xbf16>
    %cst_53 = arith.constant dense<0.000000e+00> : vector<8x32xf32>
    %103 = tpu.matmul %102, %75, %cst_53 {dimension_numbers = #tpu.dot_dimension_numbers<[1], [0], [0], [1], [0, 0, 1, 1], [], []>} : vector<8x16xbf16>, vector<16x32xbf16>, vector<8x32xf32> -> vector<8x32xf32>
    %104 = vector.extract_strided_slice %86 {offsets = [0, 0], sizes = [8, 32], strides = [1, 1]} : vector<8x128xf32> to vector<8x32xf32>
    %105 = vector.extract_strided_slice %4 {offsets = [0, 96], sizes = [8, 32], strides = [1, 1]} : vector<8x128xbf16> to vector<8x32xbf16>
    %106 = vector.extract_strided_slice %6 {offsets = [0, 96], sizes = [16, 32], strides = [1, 1]} : vector<16x128xbf16> to vector<16x32xbf16>
    %107 = vector.extract_strided_slice %8 {offsets = [0, 96], sizes = [16, 32], strides = [1, 1]} : vector<16x128xbf16> to vector<16x32xbf16>
    %cst_54 = arith.constant dense<0.000000e+00> : vector<8x16xf32>
    %108 = tpu.matmul %105, %106, %cst_54 {dimension_numbers = #tpu.dot_dimension_numbers<[1], [1], [0], [0], [0, 0, 1, 0], [], []>} : vector<8x32xbf16>, vector<16x32xbf16>, vector<8x16xf32> -> vector<8x16xf32>
    %c3 = arith.constant 3 : index
    %c0_55 = arith.constant 0 : index
    %c0_56 = arith.constant 0 : index
    %109 = vector.load %arg7[%c3, %c0_55, %c0_56] : memref<4x8x128xf32, #tpu.memory_space<vmem>>, vector<1x8x128xf32>
    %110 = vector.shape_cast %109 : vector<1x8x128xf32> to vector<8x128xf32>
    %c3_57 = arith.constant 3 : index
    %c0_58 = arith.constant 0 : index
    %c0_59 = arith.constant 0 : index
    %111 = vector.load %arg8[%c3_57, %c0_58, %c0_59] : memref<4x8x128xf32, #tpu.memory_space<vmem>>, vector<1x8x128xf32>
    %112 = vector.shape_cast %111 : vector<1x8x128xf32> to vector<8x128xf32>
    %cst_60 = arith.constant dense<0xFF800000> : vector<8xf32>
    %113 = vector.multi_reduction <maximumf>, %108, %cst_60 [1] : vector<8x16xf32> to vector<8xf32>
    %114 = vector.shape_cast %113 : vector<8xf32> to vector<8x1xf32>
    %115 = vector.broadcast %114 : vector<8x1xf32> to vector<8x128xf32>
    %116 = arith.maximumf %110, %115 : vector<8x128xf32>
    %117 = arith.subf %110, %116 : vector<8x128xf32>
    %118 = math.exp %117 : vector<8x128xf32>
    %119 = vector.extract_strided_slice %116 {offsets = [0, 0], sizes = [8, 1], strides = [1, 1]} : vector<8x128xf32> to vector<8x1xf32>
    %120 = vector.broadcast %119 : vector<8x1xf32> to vector<8x16xf32>
    %121 = arith.subf %108, %120 : vector<8x16xf32>
    %122 = math.exp %121 : vector<8x16xf32>
    %123 = arith.mulf %118, %112 : vector<8x128xf32>
    %cst_61 = arith.constant dense<0.000000e+00> : vector<8xf32>
    %124 = vector.multi_reduction <add>, %122, %cst_61 [1] : vector<8x16xf32> to vector<8xf32>
    %125 = vector.shape_cast %124 : vector<8xf32> to vector<8x1xf32>
    %126 = vector.broadcast %125 : vector<8x1xf32> to vector<8x128xf32>
    %127 = arith.addf %123, %126 : vector<8x128xf32>
    %c3_62 = arith.constant 3 : index
    %c0_63 = arith.constant 0 : index
    %c0_64 = arith.constant 0 : index
    %128 = vector.load %arg8[%c3_62, %c0_63, %c0_64] : memref<4x8x128xf32, #tpu.memory_space<vmem>>, vector<1x8x128xf32>
    %129 = vector.shape_cast %128 : vector<1x8x128xf32> to vector<8x128xf32>
    %130 = vector.shape_cast %127 : vector<8x128xf32> to vector<1x8x128xf32>
    tpu.vector_store %arg8[%c3_62, %c0_63, %c0_64], %130 {strides = array<i32>} : memref<4x8x128xf32, #tpu.memory_space<vmem>>, vector<1x8x128xf32>,
    %c3_65 = arith.constant 3 : index
    %c0_66 = arith.constant 0 : index
    %c0_67 = arith.constant 0 : index
    %131 = vector.load %arg7[%c3_65, %c0_66, %c0_67] : memref<4x8x128xf32, #tpu.memory_space<vmem>>, vector<1x8x128xf32>
    %132 = vector.shape_cast %131 : vector<1x8x128xf32> to vector<8x128xf32>
    %133 = vector.shape_cast %116 : vector<8x128xf32> to vector<1x8x128xf32>
    tpu.vector_store %arg7[%c3_65, %c0_66, %c0_67], %133 {strides = array<i32>} : memref<4x8x128xf32, #tpu.memory_space<vmem>>, vector<1x8x128xf32>,
    %134 = arith.truncf %122 : vector<8x16xf32> to vector<8x16xbf16>
    %cst_68 = arith.constant dense<0.000000e+00> : vector<8x32xf32>
    %135 = tpu.matmul %134, %107, %cst_68 {dimension_numbers = #tpu.dot_dimension_numbers<[1], [0], [0], [1], [0, 0, 1, 1], [], []>} : vector<8x16xbf16>, vector<16x32xbf16>, vector<8x32xf32> -> vector<8x32xf32>
    %136 = vector.extract_strided_slice %118 {offsets = [0, 0], sizes = [8, 32], strides = [1, 1]} : vector<8x128xf32> to vector<8x32xf32>
    %137 = tpu.concatenate %39, %71, %103, %135 in 1 : vector<8x32xf32>, vector<8x32xf32>, vector<8x32xf32>, vector<8x32xf32> -> vector<8x128xf32>
    %138 = tpu.concatenate %40, %72, %104, %136 in 1 : vector<8x32xf32>, vector<8x32xf32>, vector<8x32xf32>, vector<8x32xf32> -> vector<8x128xf32>
    %c0_69 = arith.constant 0 : index
    %c0_70 = arith.constant 0 : index
    %139 = vector.load %arg9[%c0_69, %c0_70] : memref<8x128xf32, #tpu.memory_space<vmem>>, vector<8x128xf32>
    %140 = arith.mulf %138, %139 : vector<8x128xf32>
    %141 = arith.addf %140, %137 : vector<8x128xf32>
    %c0_71 = arith.constant 0 : index
    %c0_72 = arith.constant 0 : index
    %142 = vector.load %arg9[%c0_71, %c0_72] : memref<8x128xf32, #tpu.memory_space<vmem>>, vector<8x128xf32>
    tpu.vector_store %arg9[%c0_71, %c0_72], %141 {strides = array<i32>} : memref<8x128xf32, #tpu.memory_space<vmem>>, vector<8x128xf32>,
    %c0_i32_73 = arith.constant 0 : i32
    %143 = arith.cmpi eq, %arg2, %c0_i32_73 : i32
    %144 = arith.extui %143 : i1 to i32
    %c0_i32_74 = arith.constant 0 : i32
    %145 = arith.cmpi ne, %144, %c0_i32_74 : i32
    scf.if %145 {
      %c0_75 = arith.constant 0 : index
      %c0_76 = arith.constant 0 : index
      %146 = vector.load %arg9[%c0_75, %c0_76] : memref<8x128xf32, #tpu.memory_space<vmem>>, vector<8x128xf32>
      %c0_77 = arith.constant 0 : index
      %c0_78 = arith.constant 0 : index
      %c0_79 = arith.constant 0 : index
      %147 = vector.load %arg8[%c0_77, %c0_78, %c0_79] : memref<4x8x128xf32, #tpu.memory_space<vmem>>, vector<1x8x128xf32>
      %148 = vector.shape_cast %147 : vector<1x8x128xf32> to vector<8x128xf32>
      %149 = tpu.reciprocal %148 {approx = true} : vector<8x128xf32> -> vector<8x128xf32>
      %150 = vector.extract_strided_slice %149 {offsets = [0, 0], sizes = [8, 32], strides = [1, 1]} : vector<8x128xf32> to vector<8x32xf32>
      %151 = vector.extract_strided_slice %146 {offsets = [0, 0], sizes = [8, 32], strides = [1, 1]} : vector<8x128xf32> to vector<8x32xf32>
      %152 = arith.mulf %151, %150 : vector<8x32xf32>
      %c1_80 = arith.constant 1 : index
      %c0_81 = arith.constant 0 : index
      %c0_82 = arith.constant 0 : index
      %153 = vector.load %arg8[%c1_80, %c0_81, %c0_82] : memref<4x8x128xf32, #tpu.memory_space<vmem>>, vector<1x8x128xf32>
      %154 = vector.shape_cast %153 : vector<1x8x128xf32> to vector<8x128xf32>
      %155 = tpu.reciprocal %154 {approx = true} : vector<8x128xf32> -> vector<8x128xf32>
      %156 = vector.extract_strided_slice %155 {offsets = [0, 0], sizes = [8, 32], strides = [1, 1]} : vector<8x128xf32> to vector<8x32xf32>
      %157 = vector.extract_strided_slice %146 {offsets = [0, 32], sizes = [8, 32], strides = [1, 1]} : vector<8x128xf32> to vector<8x32xf32>
      %158 = arith.mulf %157, %156 : vector<8x32xf32>
      %c2_83 = arith.constant 2 : index
      %c0_84 = arith.constant 0 : index
      %c0_85 = arith.constant 0 : index
      %159 = vector.load %arg8[%c2_83, %c0_84, %c0_85] : memref<4x8x128xf32, #tpu.memory_space<vmem>>, vector<1x8x128xf32>
      %160 = vector.shape_cast %159 : vector<1x8x128xf32> to vector<8x128xf32>
      %161 = tpu.reciprocal %160 {approx = true} : vector<8x128xf32> -> vector<8x128xf32>
      %162 = vector.extract_strided_slice %161 {offsets = [0, 0], sizes = [8, 32], strides = [1, 1]} : vector<8x128xf32> to vector<8x32xf32>
      %163 = vector.extract_strided_slice %146 {offsets = [0, 64], sizes = [8, 32], strides = [1, 1]} : vector<8x128xf32> to vector<8x32xf32>
      %164 = arith.mulf %163, %162 : vector<8x32xf32>
      %c3_86 = arith.constant 3 : index
      %c0_87 = arith.constant 0 : index
      %c0_88 = arith.constant 0 : index
      %165 = vector.load %arg8[%c3_86, %c0_87, %c0_88] : memref<4x8x128xf32, #tpu.memory_space<vmem>>, vector<1x8x128xf32>
      %166 = vector.shape_cast %165 : vector<1x8x128xf32> to vector<8x128xf32>
      %167 = tpu.reciprocal %166 {approx = true} : vector<8x128xf32> -> vector<8x128xf32>
      %168 = vector.extract_strided_slice %167 {offsets = [0, 0], sizes = [8, 32], strides = [1, 1]} : vector<8x128xf32> to vector<8x32xf32>
      %169 = vector.extract_strided_slice %146 {offsets = [0, 96], sizes = [8, 32], strides = [1, 1]} : vector<8x128xf32> to vector<8x32xf32>
      %170 = arith.mulf %169, %168 : vector<8x32xf32>
      %171 = tpu.concatenate %152, %158, %164, %170 in 1 : vector<8x32xf32>, vector<8x32xf32>, vector<8x32xf32>, vector<8x32xf32> -> vector<8x128xf32>
      %c0_89 = arith.constant 0 : index
      %c0_90 = arith.constant 0 : index
      %c0_91 = arith.constant 0 : index
      %172 = vector.load %arg6[%c0_89, %c0_90, %c0_91] : memref<1x8x128xf32, #tpu.memory_space<vmem>>, vector<1x8x128xf32>
      %173 = vector.shape_cast %172 : vector<1x8x128xf32> to vector<8x128xf32>
      %174 = vector.shape_cast %171 : vector<8x128xf32> to vector<1x8x128xf32>
      tpu.vector_store %arg6[%c0_89, %c0_90, %c0_91], %174 {strides = array<i32>} : memref<1x8x128xf32, #tpu.memory_space<vmem>>, vector<1x8x128xf32>,
    } else {
    }
    return
  }
  func.func @transform_0(%arg0: i32, %arg1: i32, %arg2: i32) -> (i32, i32, i32) {
    %c0_i32 = arith.constant 0 : i32
    %c0_i32_0 = arith.constant 0 : i32
    return %arg0, %arg1, %c0_i32 : i32, i32, i32
  }
  func.func @transform_1(%arg0: i32, %arg1: i32, %arg2: i32) -> (i32, i32, i32) {
    %c0_i32 = arith.constant 0 : i32
    %c0_i32_0 = arith.constant 0 : i32
    return %arg0, %arg2, %c0_i32 : i32, i32, i32
  }
  func.func @transform_2(%arg0: i32, %arg1: i32, %arg2: i32) -> (i32, i32, i32) {
    %c0_i32 = arith.constant 0 : i32
    %c0_i32_0 = arith.constant 0 : i32
    return %arg0, %arg2, %c0_i32 : i32, i32, i32
  }
  func.func @transform_3(%arg0: i32, %arg1: i32, %arg2: i32) -> (i32, i32, i32) {
    %c0_i32 = arith.constant 0 : i32
    %c0_i32_0 = arith.constant 0 : i32
    return %arg0, %arg1, %c0_i32 : i32, i32, i32
  }
}

</mosaic_0001>

<bundles_post_ra>
// kernel: tpu_custom_call.1
= control target key start
LH: loop header
LB: loop body
LE: loop exit
PB: predicated region body
PF: predicated region fallthrough
CT: control target
= control target key end

     0   :  { %s1791_s0 = inlined_call_operand.hbm [shape: bf16[2,8,128], index: 0, kind: input, shape index: {}]   ;;  %s1792_s1 = inlined_call_operand.hbm [shape: bf16[2,16,128], index: 1, kind: input, shape index: {}]   ;;  %s1793_s2 = inlined_call_operand.hbm [shape: bf16[2,16,128], index: 2, kind: input, shape index: {}]   ;;  %s1794_s3 = inlined_call_operand.hbm [shape: f32[2,8,128], index: 3, kind: output, shape index: {}]  }
   0x1   :  { %1802 = sst [smem:[#allocation18_spill]] %s1792_s1 }
   0x2   :  { %8 = vsyncpa [#allocation6], 0 }
   0x3   :  { %10 = vsyncpa [#allocation6 + $0x1], 0 }
   0x4   :  { %11 = vsyncpa [#allocation9], 0 }
   0x5   :  { %13 = vsyncpa [#allocation9 + $0x1], 0 }
   0x6   :  { %14 = vsyncpa [#allocation7], 0 }
   0x7   :  { %16 = vsyncpa [#allocation7 + $0x1], 0  ;;  %s1447_s12 = smov 0   ;;  %s1449_s13 = smov 0  }
   0x8   :  { %s1451_s14 = smov 0   ;;  %s1453_s15 = smov 0  }
   0x9   :  { %s1455_s16 = smov 0   ;;  %s1457_s17 = smov 0  }
   0xa LB: > { %1803 = sst [smem:[#allocation15_spill]] %s1401_s14  ;;  %s1478_s18 = sadd.s32 4294967295, %s1413_s17   ;;  %s1413_s17 = sphi %s1457_s17, %s22_s17   ;;  %s1409_s16 = sphi %s1455_s16, %s1827_s16   ;;  %s1405_s15 = sphi %s1453_s15, %s1826_s15   ;;  %s1401_s14 = sphi %s1451_s14, %s1822_s14   ;;  %s1397_s13 = sphi %s1449_s13, %s1825_s13   ;;  %s1393_s12 = sphi %s1447_s12, %s1824_s12  }
   0xb   : > { %s1031_s19 = sadd.s32 4294967294, %s1413_s17   ;;  %s41_s20 = sadd.s32 1, %s1409_s16 }
   0xc   : > { %s50_s21 = sadd.s32 1, %s1401_s14  ;;  %p43_p0 = scmp.ge.s32.totalorder %s41_s20, 2 }
   0xd   : > { %p57_p1 = scmp.ne.s32.totalorder %s1401_s14, %s1397_s13  ;;  %p58_p2 = scmp.eq.s32.totalorder %s1413_s17, 0 }
   0xe   : > { %p63_p3 = scmp.ne.s32.totalorder %s1397_s13, %s1393_s12  ;;  %s1829_s20 = smov (%p43_p0, %s41_s20), 0 }
   0xf   : > { %1804 = sst [smem:[#allocation16_spill]] %s1829_s20  ;;  %p1490_p4 = por %p58_p2, %p57_p1 }
  0x10   : > { %p64_p5 = scmp.eq.s32.totalorder %s1478_s18, 0  ;;  %s45_s23 = ssub.s32 %s1409_s16, %s1829_s20 }
  0x11   : > { %p145_p6 = scmp.eq.s32.totalorder %s1478_s18, 1  ;;  %p48_p7 = scmp.eq.s32.totalorder %s45_s23, 0 }
  0x12   : > { %p1498_p8 = por %p64_p5, %p63_p3  ;;  %p151_p10 = scmp.eq.s32.totalorder %s1031_s19, 1 }
  0x13   : > { %p1502_p9 = por %p145_p6, %p57_p1  ;;  %p1150_p13 = scmp.lt.s32.totalorder %s1413_s17, 2 }
  0x14   : > { %s1806_s24 = scalar_select %p1498_p8, 1, 0 }
  0x15   : > { %s1807_s25 = scalar_select %p1502_p9, 1, 0 }
  0x16   : > { %s1507_s26 = scalar_select %p48_p7, %s1401_s14, %s50_s21  }
  0x17   : > { %p1509_p11 = por %p151_p10, %p63_p3  ;;  %s1516_s28 = sand.u32 1, %s1401_s14  }
  0x18   : > { %1808 = sst [smem:[#allocation17_spill]] %s1507_s26  ;;  %s190_s29 = sand.u32 1, %s1413_s17  }
  0x19   : > { %s1809_s27 = scalar_select %p1509_p11, 1, 0 }
  0x1a   : > { %s1036_s30 = sshll.u32 %s1516_s28, 3  ;;  %p1522_p0 = pnand %p1150_p13, %p1490_p4 }
  0x1b   : > { %s1062_s5 = sshll.u32 %s1409_s16, 7  ;;  %s1811_s1 = sld [smem:[#allocation18_spill]] }
  0x1c   : > { %s1810_s4 = scalar_select %p1522_p0, 1, 0 }
  0x1d   : > { %s194_s9 = scalar_lea.vmem [#allocation8], %s1036_s30  ;;  %s1538_s11 = scalar_lea.sflag [#allocation9], %s190_s29 }
  0x1e   : > { %s203_s10 = sshll.u32 %s194_s9, 4  ;;  %p1544_p2 = pneg %p1522_p0  ;;  %s1536_s10 = int_to_ptr.vmem [resolvable:$true] %s203_s10 }
  0x21   : > { %s1532_s8 = scalar_lea.hbm %s1811_s1, %s1062_s5  ;;  %s1242_s6 = scalar_lea.hbm %s1811_s1, 256 }
  0x22   : > { %s1237_s19 = scalar_lea.hbm %s1532_s8, 128  ;;  %p1243_p5 = scmp.lt.u32.totalorder %s1532_s8, %s1811_s1 }
  0x23   : > { %p1238_p1 = scmp.ne.s32.totalorder %s1532_s8, %s1237_s19  ;;  %p1244_p6 = scmp.lt.u32.totalorder %s1242_s6, %s1237_s19 }
  0x24   : > { %p1246_p10 = scmp.lt.u32.totalorder %s1237_s19, %s1532_s8 }
  0x25   : > { %p1240_p3 = pnand %p1544_p2, %p1238_p1  ;;  %p1245_p7 = por %p1244_p6, %p1243_p5 }
  0x27   : > { %p1241_p4 = pneg %p1240_p3  ;;  %p1247_p13 = por %p1246_p10, %p1245_p7 }
  0x29   : > { %p1248_p12 = pnand %p1247_p13, %p1241_p4 }
  0x2b   : > { %1251 = shalt.err (!%p1248_p12)
}
  0x2c   : > { %s1252_s29 = scalar_lea.vmem %s1536_s10, 128  ;;  %s1415_s22 = smov [#allocation8]  }
  0x2d   : > { %p1253_p1 = scmp.ne.s32.totalorder %s1536_s10, %s1252_s29  ;;  %s1257_s23 = sshll.u32 %s1415_s22, 4  ;;  %s1258_s23 = int_to_ptr.vmem [resolvable:$false] %s1257_s23 }
  0x2e   : > { %s1259_s7 = scalar_lea.vmem %s1258_s23, 256  ;;  %p1260_p9 = scmp.lt.s32.totalorder %s1536_s10, %s1258_s23 }
  0x2f   : > { %p1255_p3 = pnand %p1253_p1, %p1544_p2  ;;  %p1261_p8 = scmp.lt.s32.totalorder %s1259_s7, %s1252_s29 }
  0x31   : > { %p1256_p11 = pneg %p1255_p3  ;;  %p1262_p5 = por %p1261_p8, %p1260_p9 }
  0x33   : > { %p1263_p6 = pnand %p1262_p5, %p1256_p11 }
  0x35   : > { %1266 = shalt.err (!%p1263_p6)
}
  0x36   : > { %s1799_s19 = smov 64   ;;  %s1417_s6 = smov 4  }
  0x37   : > { %1142 = dma.hbm_to_vmem [thread:$0]  (!%p1522_p0), %s1532_s8, 128, %s1536_s10, %s1538_s11, %s1799_s19, %s1799_s19, %s1417_s6  }
  0x38   : > { %s1576_s22 = scalar_lea.hbm %s1793_s2, %s1062_s5  ;;  %p1042_p8 = scmp.ge.s32.totalorder %s1413_s17, 1 }
  0x39   : > { %s217_s23 = scalar_lea.vmem [#allocation10], %s1036_s30  ;;  %p234_p9 = scmp.lt.s32.totalorder %s1413_s17, 3 }
  0x3a   : > { %s226_s7 = sshll.u32 %s217_s23, 4  ;;  %s1034_s20 = sshll.u32 %s1516_s28, 2  ;;  %s1593_s7 = int_to_ptr.vmem [resolvable:$true] %s226_s7 }
  0x3b   : > { %p1582_p11 = pnand %p1042_p8, %p234_p9  ;;  %s1035_s26 = sshll.u32 %s1409_s16, 6 }
  0x3c   : > { %s1591_s10 = scalar_lea.hbm %s1791_s0, %s1035_s26  ;;  %s175_s30 = scalar_lea.vmem [#allocation5], %s1034_s20 }
  0x3d   : > { %s1813_s1 = scalar_select %p1582_p11, 1, 0 }
  0x3e   : > { %s183_s5 = sshll.u32 %s175_s30, 4  ;;  %s172_s9 = scalar_lea.sflag [#allocation6], %s1516_s28  ;;  %s184_s5 = int_to_ptr.vmem [resolvable:$true] %s183_s5 }
  0x3f   : > { %s1267_s29 = scalar_lea.hbm %s1591_s10, 64  ;;  %s1272_s14 = scalar_lea.hbm %s1791_s0, 128 }
  0x40   : > { %p1268_p12 = scmp.ne.s32.totalorder %s1591_s10, %s1267_s29  ;;  %p1273_p10 = scmp.lt.u32.totalorder %s1591_s10, %s1791_s0 }
  0x41   : > { %p1274_p13 = scmp.lt.u32.totalorder %s1272_s14, %s1267_s29  ;;  %p1276_p3 = scmp.lt.u32.totalorder %s1267_s29, %s1591_s10 }
  0x42   : > { %p1270_p4 = pnand %p1268_p12, %p1544_p2 }
  0x43   : > { %p1275_p1 = por %p1274_p13, %p1273_p10 }
  0x44   : > { %p1271_p7 = pneg %p1270_p4 }
  0x45   : > { %p1277_p5 = por %p1276_p3, %p1275_p1 }
  0x47   : > { %p1278_p6 = pnand %p1277_p5, %p1271_p7 }
  0x49   : > { %1281 = shalt.err (!%p1278_p6)
}
  0x4a   : > { %s1282_s20 = scalar_lea.vmem %s184_s5, 64  ;;  %s1418_s28 = smov [#allocation5]  }
  0x4b   : > { %p1283_p8 = scmp.ne.s32.totalorder %s184_s5, %s1282_s20  ;;  %s1287_s30 = sshll.u32 %s1418_s28, 4  ;;  %s1288_s30 = int_to_ptr.vmem [resolvable:$false] %s1287_s30 }
  0x4c   : > { %s1289_s19 = scalar_lea.vmem %s1288_s30, 128  ;;  %p1290_p4 = scmp.lt.s32.totalorder %s184_s5, %s1288_s30 }
  0x4d   : > { %p1285_p9 = pnand %p1283_p8, %p1544_p2  ;;  %p1291_p11 = scmp.lt.s32.totalorder %s1289_s19, %s1282_s20 }
  0x4f   : > { %p1286_p12 = pneg %p1285_p9  ;;  %p1292_p0 = por %p1291_p11, %p1290_p4 }
  0x51   : > { %p1293_p10 = pnand %p1292_p0, %p1286_p12 }
  0x53   : > { %1296 = shalt.err (!%p1293_p10)
}
  0x54   : > { %p1814_p13 = scmp.ne.s32.totalorder %s1810_s4, 0  ;;  %s1297_s29 = scalar_lea.hbm %s1576_s22, 128 }
  0x55   : > { %p1298_p7 = scmp.ne.s32.totalorder %s1576_s22, %s1297_s29  ;;  %s1302_s26 = scalar_lea.hbm %s1793_s2, 256 }
  0x56   : > { %1139 = dma.hbm_to_vmem [thread:$0]  (!%p1814_p13), %s1591_s10, 64, %s184_s5, %s172_s9  }
  0x57   : > { %p1300_p1 = pnand %p1298_p7, %p1544_p2  ;;  %p1303_p0 = scmp.lt.u32.totalorder %s1576_s22, %s1793_s2 }
  0x58   : > { %p1304_p11 = scmp.lt.u32.totalorder %s1302_s26, %s1297_s29  ;;  %p1306_p6 = scmp.lt.u32.totalorder %s1297_s29, %s1576_s22 }
  0x59   : > { %p1301_p3 = pneg %p1300_p1 }
  0x5a   : > { %p1305_p5 = por %p1304_p11, %p1303_p0 }
  0x5c   : > { %p1307_p8 = por %p1306_p6, %p1305_p5 }
  0x5e   : > { %p1308_p9 = pnand %p1307_p8, %p1301_p3 }
  0x60   : > { %1311 = shalt.err (!%p1308_p9)
}
  0x61   : > { %s1312_s10 = scalar_lea.vmem %s1593_s7, 128  ;;  %s1419_s5 = smov [#allocation10]  }
  0x62   : > { %p1313_p12 = scmp.ne.s32.totalorder %s1593_s7, %s1312_s10  ;;  %s1317_s9 = sshll.u32 %s1419_s5, 4  ;;  %s1318_s9 = int_to_ptr.vmem [resolvable:$false] %s1317_s9 }
  0x63   : > { %s1319_s28 = scalar_lea.vmem %s1318_s9, 256  ;;  %p1320_p7 = scmp.lt.s32.totalorder %s1593_s7, %s1318_s9 }
  0x64   : > { %p1315_p4 = pnand %p1313_p12, %p1544_p2  ;;  %p1321_p1 = scmp.lt.s32.totalorder %s1319_s28, %s1312_s10 }
  0x66   : > { %p1316_p10 = pneg %p1315_p4  ;;  %p1322_p0 = por %p1321_p1, %p1320_p7 }
  0x68   : > { %p1323_p11 = pnand %p1322_p0, %p1316_p10 }
  0x6a   : > { %1326 = shalt.err (!%p1323_p11)
}
  0x6b   : > { %s1815_s30 = smov 64   ;;  %p1816_p2 = scmp.ne.s32.totalorder %s1813_s1, 0 }
  0x6c   : > { %1145 = dma.hbm_to_vmem [thread:$0]  (!%p1814_p13), %s1576_s22, 128, %s1593_s7, %s1538_s11, %s1815_s30, %s1815_s30, %s1417_s6  }
  0x6d   : > { %238 = sbr.rel (%p1816_p2) target bundleno = 1512 (0x5e8), region = 32  ;;  %s1641_s21 = sand.u32 (!%p1816_p2), 1, %s1397_s13  }
  0x6e   : > { %s1043_s19 = sshll.u32 (!%p1816_p2), %s1641_s21, 2  ;;  %s241_s29 = scalar_lea.sflag (!%p1816_p2), [#allocation6], %s1641_s21 }
  0x6f   : > { %s244_s23 = scalar_lea.vmem (!%p1816_p2), [#allocation5], %s1043_s19  ;;  %p1817_p3 = scmp.ne.s32.totalorder (!%p1816_p2), %s1806_s24, 0 }
  0x74   : > { %1380 = dma.done.wait (%p1817_p3), %s241_s29, 64  }
  0x75   : > { %1382 = vsyncadd (%p1817_p3), %s241_s29, 4294967232  ;;  %s249_s4 = sand.u32 1, %s1478_s18   ;;  %s1651_s1 = sshll.u32 %s1641_s21, 3 }
  0x76   : > { %s250_s11 = scalar_lea.sflag [#allocation9], %s249_s4  ;;  %s253_s6 = scalar_lea.vmem [#allocation8], %s1651_s1 }
  0x77   : > { %1384 = dma.done.wait (%p1817_p3), %s250_s11, 256  }
  0x78   : > { %1386 = vsyncadd (%p1817_p3), %s250_s11, 4294967040  ;;  %v1420_v0 = vmov 0.0   ;;  %vm1421_vm0 = vmmov 0   ;;  %vm321_vm1 = vcmask 261120   ;;  %v1210_v1 = vld [vmem:[%s253_s6] sm:$0xff]   ;;  %v1422_v4 = vmov 0  }
  0x79   : > { %1080 = vmatprep.subr.bf16.mxu0 %v1420_v0  ;;  %1082 = vmatprep.mubr.msk.bf16.mxu0 %vm1421_vm0, %v1420_v0  ;;  %v326_v2 = vsel %vm321_vm1, %v1210_v1, 0  ;;  %v311_v3 = vld [vmem:[%s244_s23] sm:$0xf]  ;;  %vm370_vm2 = vcmask 130048   ;;  %s1423_s18 = smov 96   ;;  %s1424_s24 = smov 64  }
  0x7a   : > { %1086 = vmatprep.subr.bf16.mxu1 %v1420_v0  ;;  %1088 = vmatprep.mubr.msk.bf16.mxu1 %vm1421_vm0, %v1420_v0  ;;  %v1051_v10 = vcombine.low %v311_v3, %v311_v3  ;;  %s1425_s22 = smov 32   ;;  %s262_s7 = scalar_lea.vmem [#allocation10], %s1651_s1  ;;  %vm828_vm3 = vcmask 523264   ;;  %vm830_vm4 = vcmask 785408  }
  0x7b   : > { %1081 = vmatpush3.bf16.xpose.msra.mxu0 %v326_v2  ;;  %1208 = vset.pattern.permute.xlu0 %v1422_v4  ;;  %v1212_v12 = vld [vmem:[%s262_s7] sm:$0xff]   ;;  %s1059_s14 = sshll.u32 %s1405_s15, 7  ;;  %s294_s26 = scalar_lea.vmem [#allocation11], %s1651_s1 }
  0x7c   : > { %1098 = vmatprep.subr.bf16.mxu0 %v1420_v0  ;;  %1209 = vset.pattern.permute.xlu1 %v1422_v4  ;;  %s898_s8 = sshll.u32 %s294_s26, 4  ;;  %s1741_s5 = scalar_lea.hbm %s1794_s3, %s1059_s14  ;;  %s1743_s8 = int_to_ptr.vmem [resolvable:$true] %s898_s8 }
  0x7d   : > { %448 = vrot.lane.b32.xlu1 %v1210_v1, %s1423_s18  ;;  %1087 = vmatpush3.bf16.msra.mxu1 %v1212_v12  ;;  %s884_s15 = scalar_lea.sflag [#allocation7], %s1641_s21  ;;  %s1327_s9 = scalar_lea.vmem %s1743_s8, 128 }
  0x7e   : > { %1092 = vmatprep.subr.bf16.mxu1 %v1420_v0  ;;  %p1328_p13 = scmp.ne.s32.totalorder %s1743_s8, %s1327_s9  ;;  %p1818_p5 = scmp.ne.s32.totalorder %s1807_s25, 0 }
  0x7f   : > { %s1426_s28 = smov [#allocation11]  }
  0x80   : > { %p1329_p6 = pnand %p1328_p13, %p1818_p5  ;;  %s1331_s30 = sshll.u32 %s1426_s28, 4  ;;  %s1332_s30 = int_to_ptr.vmem [resolvable:$false] %s1331_s30 }
  0x81   : > { %446 = vrot.lane.b32.xlu1 %v1051_v10, %s1423_s18  ;;  %s1333_s19 = scalar_lea.vmem %s1332_s30, 256  ;;  %p1334_p9 = scmp.lt.s32.totalorder %s1743_s8, %s1332_s30 }
  0x82   : > { %1083 = vmatmul.mubr.msk.bf16.vlgmr.msra.gmra.mrb[0].mxu0 %vm321_vm1, %v311_v3  ;;  %p1330_p8 = pneg %p1329_p6  ;;  %p1335_p12 = scmp.lt.s32.totalorder %s1333_s19, %s1327_s9 }
  0x83   : > { %1100 = vmatprep.mubr.msk.bf16.mxu0 %vm1421_vm0, %v1420_v0 }
  0x84   : > { %p1336_p4 = por %p1335_p12, %p1334_p9 }
  0x85   : > { %571 = vrot.lane.b32.xlu1 %v1210_v1, %s1424_s24 }
  0x86   : > { %p1337_p10 = pnand %p1336_p4, %p1330_p8 }
  0x89   : > { %569 = vrot.lane.b32.xlu1 %v1051_v10, %s1424_s24 }
  0x8d   : > { %694 = vrot.lane.b32.xlu1 %v1210_v1, %s1425_s22 }
  0x91   : > { %692 = vrot.lane.b32.xlu1 %v1051_v10, %s1425_s22 }
  0xef   : > { %v449_v16 = vpop.permute.xlu1 %448 }
  0xf0   : > { %v454_v19 = vsel %vm321_vm1, %v449_v16, 0 }
  0xf3   : > { %v447_v17 = vpop.permute.xlu1 %446 }
  0xf7   : > { %v572_v21 = vpop.permute.xlu1 %571 }
  0xf8   : > { %v577_v23 = vsel %vm321_vm1, %v572_v21, 0 }
  0xfb   : > { %v570_v22 = vpop.permute.xlu1 %569 }
  0xff   : > { %v695_v24 = vpop.permute.xlu1 %694 }
 0x100   : > { %v700_v25 = vsel %vm321_vm1, %v695_v24, 0 }
 0x103   : > { %v693_v26 = vpop.permute.xlu1 %692 }
 0x155   : > { %v362_v5 = vpop.f32.mrb[0].mxu0 }
 0x156   : > { %v1084_v6 = vpop.f32.mrb[1].mxu0  ;;  %v371_v7 = vsel %vm370_vm2, %v362_v5, -inf }
 0x157   : > { %372 = vmax.xlane.f32.xlu0 %v371_v7  ;;  %v365_v8 = vpop.f32.mrb[2].mxu0 }
 0x158   : > { %v1085_v9 = vpop.f32.mrb[3].mxu0 }
 0x1e4   : > { %v1676_v11 = vpop.xlane.xlu0 %372 }
 0x1e5   : > { %380 = vperm.xlu0 %1208, %v1676_v11  }
 0x264   : > { %v381_v13 = vpop.permute.xlu0 %380 }
 0x265   : > { %v383_v14 = vsub.f32 %v362_v5, %v381_v13 }
 0x267   : > { %v384_v15 = vmul.f32 1.442695, %v383_v14 }
 0x269   : > { %1213 = vpow2.f32 %v384_v15 }
 0x273   : > { %v1214_v18 = vpop.eup %1213 }
 0x274   : > { %v393_v20 = vpack.c.bf16 %v1214_v18, %v1214_v18  ;;  %v387_v49 = vsel %vm370_vm2, %v1214_v18, 0.0 }
 0x276   : > { %1089 = vmatmul.mubr.msk.bf16.vlgmr.msra.gmra.mrb[0].mxu1 %vm370_vm2, %v393_v20 }
 0x277   : > { %1093 = vmatpush3.bf16.xpose.msra.mxu1 %v454_v19  ;;  %1094 = vmatprep.mubr.msk.bf16.mxu1 %vm1421_vm0, %v1420_v0 }
 0x278   : > { %1104 = vmatprep.subr.bf16.mxu1 %v1420_v0 }
 0x27e   : > { %1095 = vmatmul.mubr.msk.bf16.vlgmr.msra.gmra.mrb[4].mxu1 %vm321_vm1, %v447_v17 }
 0x27f   : > { %1105 = vmatpush3.bf16.xpose.msra.mxu1 %v577_v23  ;;  %1106 = vmatprep.mubr.msk.bf16.mxu1 %vm1421_vm0, %v1420_v0 }
 0x280   : > { %1116 = vmatprep.subr.bf16.mxu1 %v1420_v0 }
 0x286   : > { %1107 = vmatmul.mubr.msk.bf16.vlgmr.msra.gmra.mrb[8].mxu1 %vm321_vm1, %v570_v22 }
 0x287   : > { %1117 = vmatpush3.bf16.xpose.msra.mxu1 %v700_v25  ;;  %1118 = vmatprep.mubr.msk.bf16.mxu1 %vm1421_vm0, %v1420_v0 }
 0x28e   : > { %1119 = vmatmul.mubr.msk.bf16.vlgmr.msra.gmra.mrb[12].mxu1 %vm321_vm1, %v693_v26 }
 0x349   : > { %v1696_v27 = vpop.f32.mrb[0].mxu1 }
 0x34a   : > { %v1090_v28 = vpop.f32.mrb[1].mxu1 }
 0x34b   : > { %v440_v29 = vpop.f32.mrb[2].mxu1 }
 0x34c   : > { %v1091_v30 = vpop.f32.mrb[3].mxu1 }
 0x351   : > { %v490_v31 = vpop.f32.mrb[4].mxu1 }
 0x352   : > { %v1096_v32 = vpop.f32.mrb[5].mxu1  ;;  %v500_v33 = vsel %vm370_vm2, %v490_v31, -inf }
 0x353   : > { %501 = vmax.xlane.f32.xlu1 %v500_v33  ;;  %v493_v34 = vpop.f32.mrb[6].mxu1 }
 0x354   : > { %v1097_v35 = vpop.f32.mrb[7].mxu1 }
 0x359   : > { %v613_v36 = vpop.f32.mrb[8].mxu1 }
 0x35a   : > { %v1108_v37 = vpop.f32.mrb[9].mxu1  ;;  %v623_v38 = vsel %vm370_vm2, %v613_v36, -inf }
 0x35b   : > { %624 = vmax.xlane.f32.xlu0 %v623_v38  ;;  %v616_v39 = vpop.f32.mrb[10].mxu1 }
 0x35c   : > { %v1109_v40 = vpop.f32.mrb[11].mxu1 }
 0x361   : > { %v736_v41 = vpop.f32.mrb[12].mxu1 }
 0x362   : > { %v1120_v42 = vpop.f32.mrb[13].mxu1  ;;  %v746_v43 = vsel %vm370_vm2, %v736_v41, -inf }
 0x363   : > { %747 = vmax.xlane.f32.xlu1 %v746_v43  ;;  %v739_v44 = vpop.f32.mrb[14].mxu1  ;;  %v375_v43 = vsub.f32 -inf, %v1676_v11 }
 0x364   : > { %v1121_v45 = vpop.f32.mrb[15].mxu1 }
 0x365   : > { %v376_v44 = vmul.f32 1.442695, %v375_v43 }
 0x3e0   : > { %v502_v46 = vpop.xlane.xlu1 %501 }
 0x3e1   : > { %509 = vperm.xlu1 %1209, %v502_v46   ;;  %v504_v3 = vsub.f32 -inf, %v502_v46 }
 0x3e3   : > { %v505_v8 = vmul.f32 1.442695, %v504_v3 }
 0x3e8   : > { %v625_v47 = vpop.xlane.xlu0 %624 }
 0x3e9   : > { %632 = vperm.xlu0 %1208, %v625_v47   ;;  %v627_v7 = vsub.f32 -inf, %v625_v47 }
 0x3eb   : > { %v628_v10 = vmul.f32 1.442695, %v627_v7 }
 0x3f0   : > { %v748_v48 = vpop.xlane.xlu1 %747 }
 0x3f1   : > { %755 = vperm.xlu1 %1209, %v748_v48   ;;  %v750_v15 = vsub.f32 -inf, %v748_v48 }
 0x3f3   : > { %v751_v17 = vmul.f32 1.442695, %v750_v15 }
 0x3f5   : > { %523 = vrot.lane.b32.xlu1 %v1212_v12, %s1423_s18 }
 0x3f9   : > { %646 = vrot.lane.b32.xlu1 %v1212_v12, %s1424_s24 }
 0x3fd   : > { %769 = vrot.lane.b32.xlu1 %v1212_v12, %s1425_s22 }
 0x421   : > { %388 = vadd.xlane.f32.xlu1 %v387_v49 }
 0x460   : > { %v510_v50 = vpop.permute.xlu1 %509 }
 0x461   : > { %v512_v51 = vsub.f32 %v490_v31, %v510_v50 }
 0x463   : > { %v513_v52 = vmul.f32 1.442695, %v512_v51 }
 0x465   : > { %1215 = vpow2.f32 %v513_v52 }
 0x468   : > { %v633_v53 = vpop.permute.xlu0 %632 }
 0x469   : > { %v635_v54 = vsub.f32 %v613_v36, %v633_v53 }
 0x46b   : > { %v636_v55 = vmul.f32 1.442695, %v635_v54 }
 0x46d   : > { %1217 = vpow2.f32 %v636_v55 }
 0x46f   : > { %v1216_v56 = vpop.eup %1215 }
 0x470   : > { %v756_v57 = vpop.permute.xlu1 %755  ;;  %v516_v58 = vsel %vm370_vm2, %v1216_v56, 0.0  ;;  %v522_v62 = vpack.c.bf16 %v1216_v56, %v1216_v56 }
 0x471   : > { %v758_v59 = vsub.f32 %v736_v41, %v756_v57  ;;  %517 = vadd.xlane.f32.xlu0 %v516_v58 }
 0x473   : > { %v759_v60 = vmul.f32 1.442695, %v758_v59 }
 0x474   : > { %v524_v61 = vpop.permute.xlu1 %523 }
 0x475   : > { %1219 = vpow2.f32 %v759_v60  ;;  %1099 = vmatpush3.bf16.msra.mxu0 %v524_v61 }
 0x476   : > { %1110 = vmatprep.subr.bf16.mxu0 %v1420_v0  ;;  %1221 = vpow2.f32 %v505_v8 }
 0x477   : > { %v1218_v63 = vpop.eup %1217  ;;  %1223 = vpow2.f32 %v628_v10 }
 0x478   : > { %1101 = vmatmul.mubr.msk.bf16.vlgmr.msra.gmra.mrb[4].mxu0 %vm370_vm2, %v522_v62  ;;  %v639_v1 = vsel %vm370_vm2, %v1218_v63, 0.0  ;;  %v647_v2 = vpop.permute.xlu1 %646  ;;  %v645_v4 = vpack.c.bf16 %v1218_v63, %v1218_v63  ;;  %1225 = vpow2.f32 %v751_v17 }
 0x479   : > { %640 = vadd.xlane.f32.xlu0 %v639_v1  ;;  %1111 = vmatpush3.bf16.msra.mxu0 %v647_v2 }
 0x47a   : > { %1112 = vmatprep.mubr.msk.bf16.mxu0 %vm1421_vm0, %v1420_v0  ;;  %1122 = vmatprep.subr.bf16.mxu0 %v1420_v0 }
 0x47c   : > { %v770_v5 = vpop.permute.xlu1 %769 }
 0x47f   : > { %v1220_v6 = vpop.eup %1219 }
 0x480   : > { %1113 = vmatmul.mubr.msk.bf16.vlgmr.msra.gmra.mrb[8].mxu0 %vm370_vm2, %v645_v4  ;;  %v762_v9 = vsel %vm370_vm2, %v1220_v6, 0.0  ;;  %v768_v12 = vpack.c.bf16 %v1220_v6, %v1220_v6  ;;  %v1222_v13 = vpop.eup %1221 }
 0x481   : > { %763 = vadd.xlane.f32.xlu1 %v762_v9  ;;  %1123 = vmatpush3.bf16.msra.mxu0 %v770_v5  ;;  %v1224_v14 = vpop.eup %1223  ;;  %v515_v26 = vmul.f32 0.0, %v1222_v13 }
 0x482   : > { %1124 = vmatprep.mubr.msk.bf16.mxu0 %vm1421_vm0, %v1420_v0  ;;  %v638_v19 = vmul.f32 0.0, %v1224_v14  ;;  %v1226_v25 = vpop.eup %1225 }
 0x483   : > { %v761_v31 = vmul.f32 0.0, %v1226_v25 }
 0x488   : > { %1125 = vmatmul.mubr.msk.bf16.vlgmr.msra.gmra.mrb[12].mxu0 %vm370_vm2, %v768_v12 }
 0x48f   : > { %833 = vrot.lane.b32.xlu0 %v1222_v13, %s1425_s22 }
 0x492   : > { %837 = vrot.lane.b32.xlu1 %v1224_v14, %s1424_s24 }
 0x4ae   : > { %v389_v23 = vpop.xlane.xlu1 %388 }
 0x4fe   : > { %v518_v16 = vpop.xlane.xlu0 %517 }
 0x4ff   : > { %v519_v28 = vadd.f32 %v518_v16, %v515_v26 }
 0x506   : > { %v641_v18 = vpop.xlane.xlu0 %640 }
 0x507   : > { %v642_v20 = vadd.f32 %v641_v18, %v638_v19 }
 0x509   : > { %1227 = vrcp.f32 %v642_v20 }
 0x50a   : > { %1229 = vrcp.f32 %v519_v28  ;;  %v834_v46 = vpop.permute.xlu0 %833 }
 0x50e   : > { %v764_v29 = vpop.xlane.xlu1 %763 }
 0x50f   : > { %v765_v34 = vadd.f32 %v764_v29, %v761_v31 }
 0x511   : > { %1231 = vrcp.f32 %v765_v34 }
 0x512   : > { %1233 = vpow2.f32 %v376_v44  ;;  %v838_v50 = vpop.permute.xlu1 %837 }
 0x513   : > { %v1228_v30 = vpop.eup %1227 }
 0x514   : > { %v1230_v41 = vpop.eup %1229 }
 0x51b   : > { %v1232_v42 = vpop.eup %1231 }
 0x51c   : > { %v1234_v45 = vpop.eup %1233 }
 0x51d   : > { %v386_v47 = vmul.f32 0.0, %v1234_v45  ;;  %v844_v52 = vsel %vm321_vm1, %v1234_v45, %v834_v46 }
 0x51e   : > { %v845_v53 = vsel %vm828_vm3, %v844_v52, %v838_v50 }
 0x51f   : > { %v390_v49 = vadd.f32 %v389_v23, %v386_v47 }
 0x521   : > { %1235 = vrcp.f32 %v390_v49 }
 0x52b   : > { %v1236_v61 = vpop.eup %1235 }
 0x54b   : > { %v563_v0 = vpop.f32.mrb[4].mxu0 }
 0x54c   : > { %816 = vrot.lane.b32.xlu0 %v563_v0, %s1425_s22  ;;  %v1102_v21 = vpop.f32.mrb[5].mxu0 }
 0x54d   : > { %v566_v22 = vpop.f32.mrb[6].mxu0 }
 0x54e   : > { %v1103_v24 = vpop.f32.mrb[7].mxu0 }
 0x550   : > { %841 = vrot.lane.b32.xlu0 %v1226_v25, %s1423_s18 }
 0x553   : > { %v686_v32 = vpop.f32.mrb[8].mxu0 }
 0x554   : > { %868 = vrot.lane.b32.xlu0 %v1228_v30, %s1424_s24  ;;  %820 = vrot.lane.b32.xlu1 %v686_v32, %s1424_s24  ;;  %v1114_v33 = vpop.f32.mrb[9].mxu0 }
 0x555   : > { %v689_v35 = vpop.f32.mrb[10].mxu0 }
 0x556   : > { %v1115_v36 = vpop.f32.mrb[11].mxu0 }
 0x55b   : > { %v809_v37 = vpop.f32.mrb[12].mxu0 }
 0x55c   : > { %824 = vrot.lane.b32.xlu1 %v809_v37, %s1423_s18  ;;  %v1126_v38 = vpop.f32.mrb[13].mxu0 }
 0x55d   : > { %v812_v39 = vpop.f32.mrb[14].mxu0 }
 0x55e   : > { %v1127_v40 = vpop.f32.mrb[15].mxu0 }
 0x560   : > { %861 = vrot.lane.b32.xlu1 %v1230_v41, %s1425_s22 }
 0x564   : > { %875 = vrot.lane.b32.xlu1 %v1232_v42, %s1423_s18 }
 0x5be   : > { %v817_v48 = vpop.permute.xlu0 %816 }
 0x5bf   : > { %v827_v55 = vsel %vm321_vm1, %v1696_v27, %v817_v48 }
 0x5c2   : > { %v842_v51 = vpop.permute.xlu0 %841 }
 0x5c3   : > { %v846_v11 = vsel %vm830_vm4, %v845_v53, %v842_v51 }
 0x5c4   : > { %v848_v56 = vmul.f32 0.0, %v846_v11 }
 0x5c6   : > { %v821_v54 = vpop.permute.xlu1 %820  ;;  %v869_v2 = vpop.permute.xlu0 %868 }
 0x5c7   : > { %v829_v57 = vsel %vm828_vm3, %v827_v55, %v821_v54 }
 0x5ce   : > { %v825_v58 = vpop.permute.xlu1 %824 }
 0x5cf   : > { %v831_v59 = vsel %vm830_vm4, %v829_v57, %v825_v58 }
 0x5d0   : > { %v849_v60 = vadd.f32 %v848_v56, %v831_v59 }
 0x5d2   : > { %v857_v62 = vmul.f32 %v1236_v61, %v849_v60  ;;  %v862_v63 = vpop.permute.xlu1 %861  ;;  %v871_v27 = vmul.f32 %v869_v2, %v849_v60 }
 0x5d3   : > { %v864_v1 = vmul.f32 %v862_v63, %v849_v60 }
 0x5d5   : > { %v879_v3 = vsel %vm321_vm1, %v857_v62, %v864_v1 }
 0x5d6   : > { %v876_v4 = vpop.permute.xlu1 %875  ;;  %v880_v6 = vsel %vm828_vm3, %v879_v3, %v871_v27 }
 0x5d7   : > { %v878_v5 = vmul.f32 %v876_v4, %v849_v60 }
 0x5d9   : > { %v881_v7 = vsel %vm830_vm4, %v880_v6, %v878_v5 }
 0x5da   : > { %882 = vst [vmem:[%s294_s26] sm:$0xff] %v881_v7 }
 0x5db   : > { %1340 = shalt.err (!%p1337_p10)
}
 0x5dc   : > { %s1341_s21 = scalar_lea.hbm %s1741_s5, 128  ;;  %s1345_s4 = scalar_lea.hbm %s1794_s3, 256 }
 0x5dd   : > { %p1342_p7 = scmp.ne.s32.totalorder %s1741_s5, %s1341_s21  ;;  %p1346_p11 = scmp.lt.u32.totalorder %s1741_s5, %s1794_s3 }
 0x5de   : > { %p1347_p2 = scmp.lt.u32.totalorder %s1345_s4, %s1341_s21  ;;  %p1349_p13 = scmp.lt.u32.totalorder %s1341_s21, %s1741_s5 }
 0x5df   : > { %p1343_p1 = pnand %p1342_p7, %p1818_p5 }
 0x5e0   : > { %p1348_p3 = por %p1347_p2, %p1346_p11 }
 0x5e1   : > { %p1344_p0 = pneg %p1343_p1 }
 0x5e2   : > { %p1350_p6 = por %p1349_p13, %p1348_p3 }
 0x5e4   : > { %p1351_p8 = pnand %p1350_p6, %p1344_p0 }
 0x5e6   : > { %1354 = shalt.err (!%p1351_p8)
}
 0x5e7   : > { %1134 = dma.vmem_to_hbm [thread:$0]  (%p1818_p5), %s1743_s8, 128, %s1741_s5, %s884_s15  }
 0x5e8 PF: > { %s910_s6 = sand.u32 1, %s1393_s12   ;;  %p1819_p9 = scmp.ne.s32.totalorder %s1809_s27, 0 }
 0x5e9   : > { %p1820_p12 = scmp.ge.s32.totalorder %s1413_s17, 2  ;;  %s911_s18 = scalar_lea.sflag [#allocation7], %s910_s6 }
 0x5eb   : > { %p1147_p4 = pnand %p1820_p12, %p1819_p9 }
 0x5ed   : > { %1388 = dma.done.wait (!%p1147_p4), %s911_s18, 128  }
 0x5ee   : > { %1390 = vsyncadd (!%p1147_p4), %s911_s18, 4294967168  ;;  %s22_s17 = sadd.s32 1, %s1413_s17   ;;  %s1821_s24 = sld [smem:[#allocation15_spill]] }
 0x5ef   : > { %p19_p10 = scmp.ge.s32.totalorder %s22_s17, 4   ;;  %s1822_s14 = sld [smem:[#allocation17_spill]] }
 0x5f0   : > { %s1823_s25 = sld [smem:[#allocation16_spill]]  ;;  %s1824_s12 = smov %s1397_s13 }
 0x5f1   : > { %s1826_s15 = smov %s1409_s16  ;;  %21 = sbr.rel (!%p19_p10) target bundleno = 10 (0xa), region = 115 }
 0x5f4   : > { %s1825_s13 = smov %s1821_s24 }
 0x5f6   : > { %s1827_s16 = smov %s1823_s25 }
 0x5f8   :  { %916 = vsyncpa [#allocation6], 1 }
 0x5f9   :  { %918 = vsyncpa [#allocation6 + $0x1], 1 }
 0x5fa   :  { %919 = vsyncpa [#allocation9], 1 }
 0x5fb   :  { %921 = vsyncpa [#allocation9 + $0x1], 1 }
 0x5fc   :  { %922 = vsyncpa [#allocation7], 1 }
 0x5fd   :  { %924 = vsyncpa [#allocation7 + $0x1], 1 }

</bundles_post_ra>
